<compile_context>
chip_gen: v6e
topology: v6e:2x2x1
jax: 0.10.0
libtpu: 0.0.40
codegen_flags: <defaults>
</compile_context>

<pallas_src>
import jax
import jax.numpy as jnp
from jax.experimental import pallas as pl
from jax.experimental.pallas import tpu as pltpu


def _round_up(x, m):
    return ((x + m - 1) // m) * m


def _cdiv(a, b):
    return (a + b - 1) // b


def _combiner_kernel(z_ref, gfw_ref, gbw_ref,
                     w1_ref, b1_ref,          # lin_z_to_hidden      (Z, R), (1, R)
                     w2_ref, b2_ref,          # fused loc|scale      (R, 2Z), (1, 2Z)
                     mask_ref,                # (1, 2Z) int32: 1 -> loc col, 0 -> scale col
                     out_ref):                # (tb, 2Z) = [loc | scale]
    f32 = jnp.float32
    z = z_ref[...].astype(f32)                                        # (tb, Z)
    g = gfw_ref[...].astype(f32) + gbw_ref[...].astype(f32)           # (tb, R)

    # h_combined = 1/3 * (tanh(z @ W1 + b1) + g_fw + g_bw)
    h = (jnp.tanh(jnp.dot(z, w1_ref[...], preferred_element_type=f32)
                  + b1_ref[...]) + g) * (1.0 / 3.0)                   # (tb, R)

    # One fused MXU matmul for both output heads.
    out = jnp.dot(h, w2_ref[...], preferred_element_type=f32) + b2_ref[...]  # (tb, 2Z)

    # softplus only on the scale half (precomputed column mask, broadcast over
    # rows); single full lane-dense store.
    out_ref[...] = jnp.where(mask_ref[...] != 0, out,
                             jax.nn.softplus(out)).astype(out_ref.dtype)


def combiner(z_t, g_fw_t, g_bw_t, params, *,
             max_block_b=2048, min_rows_for_two_steps=1024):
    """z_t: (..., Z), g_fw_t/g_bw_t: (..., R) with identical leading dims.
    Leading dims (e.g. a time axis) are flattened into the batch so one
    pallas_call covers them all.  Returns (loc, scale), each (..., Z)."""
    w1, b1, w2, b2 = params["w1"], params["b1"], params["w2"], params["b2"]
    Z = z_t.shape[-1]
    R = g_fw_t.shape[-1]

    lead = z_t.shape[:-1]
    B = 1
    for d in lead:
        B *= d
    z2 = z_t.reshape(B, Z)
    gf2 = g_fw_t.reshape(B, R)
    gb2 = g_bw_t.reshape(B, R)
    out_dtype = z2.dtype          # bf16 inputs -> bf16 HBM traffic; math is f32.

    # --- tile / grid selection -------------------------------------------
    # Pad only to a sublane multiple (8), then pick tb as a near-divisor of
    # the padded batch so dead rows stay < 8 * n_steps.
    Bp8 = _round_up(B, 8)
    n_steps = max(1, _cdiv(Bp8, max_block_b))
    if Bp8 >= min_rows_for_two_steps:
        n_steps = max(n_steps, 2)          # v7x: keep both TensorCores busy.
    tb = _round_up(_cdiv(Bp8, n_steps), 8)
    n_steps = _cdiv(Bp8, tb)
    Bp = tb * n_steps

    if Bp != B:
        pad = ((0, Bp - B), (0, 0))
        z2 = jnp.pad(z2, pad)
        gf2 = jnp.pad(gf2, pad)
        gb2 = jnp.pad(gb2, pad)

    # Column mask computed once on the host side: 1 for loc cols, 0 for scale.
    mask = jnp.concatenate([jnp.ones((1, Z), jnp.int32),
                            jnp.zeros((1, Z), jnp.int32)], axis=1)

    # Constant index_map -> block index never changes -> Pallas keeps these
    # VMEM-resident and does not re-DMA them per grid step.
    def const_spec(shape):
        return pl.BlockSpec(shape, lambda i: (0,) * len(shape))

    out = pl.pallas_call(
        _combiner_kernel,
        out_shape=jax.ShapeDtypeStruct((Bp, 2 * Z), out_dtype),
        grid=(n_steps,),
        in_specs=[
            pl.BlockSpec((tb, Z), lambda i: (i, 0)),       # z_t
            pl.BlockSpec((tb, R), lambda i: (i, 0)),       # g_fw_t
            pl.BlockSpec((tb, R), lambda i: (i, 0)),       # g_bw_t
            const_spec((Z, R)),                            # W1
            const_spec((1, R)),                            # b1
            const_spec((R, 2 * Z)),                        # fused W2
            const_spec((1, 2 * Z)),                        # fused b2
            const_spec((1, 2 * Z)),                        # loc-column mask
        ],
        out_specs=pl.BlockSpec((tb, 2 * Z), lambda i: (i, 0)),
        compiler_params=pltpu.CompilerParams(
            dimension_semantics=("parallel",)),
    )(z2, gf2, gb2, w1, b1, w2, b2, mask)

    loc = out[:B, :Z].reshape(*lead, Z)
    scale = out[:B, Z:].reshape(*lead, Z)
    return loc, scale


def init_params(key, z_dim, rnn_dim):
    """PyTorch-like uniform init; weights stored pre-transposed (in, out).
    The loc and scale heads are fused into a single (R, 2Z) weight."""
    def linear(k, fan_in, fan_out):
        k1, k2 = jax.random.split(k)
        bound = 1.0 / jnp.sqrt(fan_in)
        w = jax.random.uniform(k1, (fan_in, fan_out), jnp.float32, -bound, bound)
        b = jax.random.uniform(k2, (1, fan_out), jnp.float32, -bound, bound)
        return w, b

    k1, k2, k3 = jax.random.split(key, 3)
    w1, b1 = linear(k1, z_dim, rnn_dim)                  # lin_z_to_hidden
    w_loc, b_loc = linear(k2, rnn_dim, z_dim)            # lin_hidden_to_loc
    w_scale, b_scale = linear(k3, rnn_dim, z_dim)        # lin_hidden_to_scale
    w2 = jnp.concatenate([w_loc, w_scale], axis=1)       # (R, 2Z)
    b2 = jnp.concatenate([b_loc, b_scale], axis=1)       # (1, 2Z)
    return dict(w1=w1, b1=b1, w2=w2, b2=b2,
                w_loc=w_loc, b_loc=b_loc, w_scale=w_scale, b_scale=b_scale)


def _reference(z, gfw, gbw, p):
    """Pure-JAX reference of the PyTorch Combiner_1 forward."""
    h = (jnp.tanh(z @ p["w1"] + p["b1"]) + gfw + gbw) * (1.0 / 3.0)
    loc = h @ p["w_loc"] + p["b_loc"]
    scale = jax.nn.softplus(h @ p["w_scale"] + p["b_scale"])
    return loc, scale


if __name__ == "__main__":
    Z_DIM, RNN_DIM = 32, 64
    key = jax.random.PRNGKey(0)
    k_z, k_f, k_b, k_p, k_z2, k_f2, k_b2 = jax.random.split(key, 7)
    params = init_params(k_p, Z_DIM, RNN_DIM)

    # --- test 1: plain batch ------------------------------------------------
    B = 8
    z_t = jax.random.normal(k_z, (B, Z_DIM), jnp.float32)
    g_fw_t = jax.random.normal(k_f, (B, RNN_DIM), jnp.float32)
    g_bw_t = jax.random.normal(k_b, (B, RNN_DIM), jnp.float32)

    loc, scale = combiner(z_t, g_fw_t, g_bw_t, params)
    jax.block_until_ready((loc, scale))

    loc_ref, scale_ref = _reference(z_t, g_fw_t, g_bw_t, params)
    assert jnp.allclose(loc, loc_ref, atol=1e-5, rtol=1e-5)
    assert jnp.allclose(scale, scale_ref, atol=1e-5, rtol=1e-5)

    # --- test 2: time axis folded into batch + non-multiple-of-8 padding ----
    T, B2 = 3, 5
    z2 = jax.random.normal(k_z2, (T, B2, Z_DIM), jnp.float32)
    gf2 = jax.random.normal(k_f2, (T, B2, RNN_DIM), jnp.float32)
    gb2 = jax.random.normal(k_b2, (T, B2, RNN_DIM), jnp.float32)

    loc2, scale2 = combiner(z2, gf2, gb2, params)
    jax.block_until_ready((loc2, scale2))

    loc2_ref, scale2_ref = _reference(z2, gf2, gb2, params)
    assert loc2.shape == (T, B2, Z_DIM) and scale2.shape == (T, B2, Z_DIM)
    assert jnp.allclose(loc2, loc2_ref, atol=1e-5, rtol=1e-5)
    assert jnp.allclose(scale2, scale2_ref, atol=1e-5, rtol=1e-5)

    print("KERNEL_OK")
</pallas_src>

<mosaic_0001>
module attributes {stable_mosaic.version = 11 : i64} {
  func.func @_combiner_kernel(%arg0: i32, %arg1: memref<8x32xf32, #tpu.memory_space<vmem>>, %arg2: memref<8x64xf32, #tpu.memory_space<vmem>>, %arg3: memref<8x64xf32, #tpu.memory_space<vmem>>, %arg4: memref<32x64xf32, #tpu.memory_space<vmem>>, %arg5: memref<1x64xf32, #tpu.memory_space<vmem>>, %arg6: memref<64x64xf32, #tpu.memory_space<vmem>>, %arg7: memref<1x64xf32, #tpu.memory_space<vmem>>, %arg8: memref<1x64xi32, #tpu.memory_space<vmem>>, %arg9: memref<8x64xf32, #tpu.memory_space<vmem>>) attributes {dimension_semantics = [#tpu.dimension_semantics<parallel>], iteration_bounds = array<i64: 1>, scalar_prefetch = 0 : i64, scratch_operands = 0 : i64, tpu.core_type = #tpu.core_type<tc>, window_params = [{transform_indices = @transform_0, window_bounds = array<i64: 8, 32>}, {transform_indices = @transform_1, window_bounds = array<i64: 8, 64>}, {transform_indices = @transform_2, window_bounds = array<i64: 8, 64>}, {pipeline_mode = #tpu.pipeline_mode<synchronous>, transform_indices = @transform_3, window_bounds = array<i64: 32, 64>}, {pipeline_mode = #tpu.pipeline_mode<synchronous>, transform_indices = @transform_4, window_bounds = array<i64: 1, 64>}, {pipeline_mode = #tpu.pipeline_mode<synchronous>, transform_indices = @transform_5, window_bounds = array<i64: 64, 64>}, {pipeline_mode = #tpu.pipeline_mode<synchronous>, transform_indices = @transform_6, window_bounds = array<i64: 1, 64>}, {pipeline_mode = #tpu.pipeline_mode<synchronous>, transform_indices = @transform_7, window_bounds = array<i64: 1, 64>}, {transform_indices = @transform_8, window_bounds = array<i64: 8, 64>}]} {
    %c0 = arith.constant 0 : index
    %c0_0 = arith.constant 0 : index
    %0 = vector.load %arg1[%c0, %c0_0] : memref<8x32xf32, #tpu.memory_space<vmem>>, vector<8x32xf32>
    %c0_1 = arith.constant 0 : index
    %c0_2 = arith.constant 0 : index
    %1 = vector.load %arg2[%c0_1, %c0_2] : memref<8x64xf32, #tpu.memory_space<vmem>>, vector<8x64xf32>
    %c0_3 = arith.constant 0 : index
    %c0_4 = arith.constant 0 : index
    %2 = vector.load %arg3[%c0_3, %c0_4] : memref<8x64xf32, #tpu.memory_space<vmem>>, vector<8x64xf32>
    %3 = arith.addf %1, %2 : vector<8x64xf32>
    %c0_5 = arith.constant 0 : index
    %c0_6 = arith.constant 0 : index
    %4 = vector.load %arg4[%c0_5, %c0_6] : memref<32x64xf32, #tpu.memory_space<vmem>>, vector<32x64xf32>
    %cst = arith.constant dense<0.000000e+00> : vector<8x64xf32>
    %5 = tpu.matmul %0, %4, %cst {dimension_numbers = #tpu.dot_dimension_numbers<[1], [0], [0], [1], [0, 0, 1, 1], [], []>} : vector<8x32xf32>, vector<32x64xf32>, vector<8x64xf32> -> vector<8x64xf32>
    %c0_7 = arith.constant 0 : index
    %c0_8 = arith.constant 0 : index
    %6 = vector.load %arg5[%c0_7, %c0_8] : memref<1x64xf32, #tpu.memory_space<vmem>>, vector<1x64xf32>
    %7 = vector.broadcast %6 : vector<1x64xf32> to vector<8x64xf32>
    %8 = arith.addf %5, %7 : vector<8x64xf32>
    %9 = math.tanh %8 : vector<8x64xf32>
    %10 = arith.addf %9, %3 : vector<8x64xf32>
    %cst_9 = arith.constant 0.333333343 : f32
    %11 = vector.broadcast %cst_9 : f32 to vector<8x64xf32>
    %12 = arith.mulf %10, %11 : vector<8x64xf32>
    %c0_10 = arith.constant 0 : index
    %c0_11 = arith.constant 0 : index
    %13 = vector.load %arg6[%c0_10, %c0_11] : memref<64x64xf32, #tpu.memory_space<vmem>>, vector<64x64xf32>
    %cst_12 = arith.constant dense<0.000000e+00> : vector<8x64xf32>
    %14 = tpu.matmul %12, %13, %cst_12 {dimension_numbers = #tpu.dot_dimension_numbers<[1], [0], [0], [1], [0, 0, 1, 1], [], []>} : vector<8x64xf32>, vector<64x64xf32>, vector<8x64xf32> -> vector<8x64xf32>
    %c0_13 = arith.constant 0 : index
    %c0_14 = arith.constant 0 : index
    %15 = vector.load %arg7[%c0_13, %c0_14] : memref<1x64xf32, #tpu.memory_space<vmem>>, vector<1x64xf32>
    %16 = vector.broadcast %15 : vector<1x64xf32> to vector<8x64xf32>
    %17 = arith.addf %14, %16 : vector<8x64xf32>
    %c0_15 = arith.constant 0 : index
    %c0_16 = arith.constant 0 : index
    %18 = vector.load %arg8[%c0_15, %c0_16] : memref<1x64xi32, #tpu.memory_space<vmem>>, vector<1x64xi32>
    %c0_i32 = arith.constant 0 : i32
    %19 = vector.broadcast %c0_i32 : i32 to vector<1x64xi32>
    %20 = arith.cmpi ne, %18, %19 : vector<1x64xi32>
    %cst_17 = arith.constant 0.000000e+00 : f32
    %21 = vector.broadcast %cst_17 : f32 to vector<8x64xf32>
    %22 = arith.maximumf %17, %21 : vector<8x64xf32>
    %23 = vector.broadcast %cst_17 : f32 to vector<8x64xf32>
    %24 = arith.subf %17, %23 : vector<8x64xf32>
    %25 = arith.cmpf one, %24, %24 : vector<8x64xf32>
    %26 = vector.broadcast %cst_17 : f32 to vector<8x64xf32>
    %27 = arith.addf %17, %26 : vector<8x64xf32>
    %28 = math.absf %24 : vector<8x64xf32>
    %cst_18 = arith.constant 0.000000e+00 : f32
    %29 = vector.broadcast %cst_18 : f32 to vector<8x64xf32>
    %30 = arith.subf %29, %28 : vector<8x64xf32>
    %31 = math.exp %30 : vector<8x64xf32>
    %32 = math.log1p %31 : vector<8x64xf32>
    %33 = arith.addf %22, %32 : vector<8x64xf32>
    %34 = arith.select %25, %27, %33 : vector<8x64xi1>, vector<8x64xf32>
    %35 = vector.shape_cast %20 : vector<1x64xi1> to vector<1x64xi1>
    %36 = vector.broadcast %35 : vector<1x64xi1> to vector<8x64xi1>
    %37 = arith.select %36, %17, %34 : vector<8x64xi1>, vector<8x64xf32>
    %c0_19 = arith.constant 0 : index
    %c0_20 = arith.constant 0 : index
    %38 = vector.load %arg9[%c0_19, %c0_20] : memref<8x64xf32, #tpu.memory_space<vmem>>, vector<8x64xf32>
    tpu.vector_store %arg9[%c0_19, %c0_20], %37 {strides = array<i32>} : memref<8x64xf32, #tpu.memory_space<vmem>>, vector<8x64xf32>,
    return
  }
  func.func @transform_0(%arg0: i32) -> (i32, i32) {
    %c0_i32 = arith.constant 0 : i32
    %c0_i32_0 = arith.constant 0 : i32
    return %arg0, %c0_i32 : i32, i32
  }
  func.func @transform_1(%arg0: i32) -> (i32, i32) {
    %c0_i32 = arith.constant 0 : i32
    %c0_i32_0 = arith.constant 0 : i32
    return %arg0, %c0_i32 : i32, i32
  }
  func.func @transform_2(%arg0: i32) -> (i32, i32) {
    %c0_i32 = arith.constant 0 : i32
    %c0_i32_0 = arith.constant 0 : i32
    return %arg0, %c0_i32 : i32, i32
  }
  func.func @transform_3(%arg0: i32) -> (i32, i32) {
    %c0_i32 = arith.constant 0 : i32
    %c0_i32_0 = arith.constant 0 : i32
    %c0_i32_1 = arith.constant 0 : i32
    return %c0_i32, %c0_i32_0 : i32, i32
  }
  func.func @transform_4(%arg0: i32) -> (i32, i32) {
    %c0_i32 = arith.constant 0 : i32
    %c0_i32_0 = arith.constant 0 : i32
    %c0_i32_1 = arith.constant 0 : i32
    return %c0_i32, %c0_i32_0 : i32, i32
  }
  func.func @transform_5(%arg0: i32) -> (i32, i32) {
    %c0_i32 = arith.constant 0 : i32
    %c0_i32_0 = arith.constant 0 : i32
    %c0_i32_1 = arith.constant 0 : i32
    return %c0_i32, %c0_i32_0 : i32, i32
  }
  func.func @transform_6(%arg0: i32) -> (i32, i32) {
    %c0_i32 = arith.constant 0 : i32
    %c0_i32_0 = arith.constant 0 : i32
    %c0_i32_1 = arith.constant 0 : i32
    return %c0_i32, %c0_i32_0 : i32, i32
  }
  func.func @transform_7(%arg0: i32) -> (i32, i32) {
    %c0_i32 = arith.constant 0 : i32
    %c0_i32_0 = arith.constant 0 : i32
    %c0_i32_1 = arith.constant 0 : i32
    return %c0_i32, %c0_i32_0 : i32, i32
  }
  func.func @transform_8(%arg0: i32) -> (i32, i32) {
    %c0_i32 = arith.constant 0 : i32
    %c0_i32_0 = arith.constant 0 : i32
    return %arg0, %c0_i32 : i32, i32
  }
}

</mosaic_0001>

<bundles_post_ra>
// kernel: tpu_custom_call.1
= control target key start
LH: loop header
LB: loop body
LE: loop exit
PB: predicated region body
PF: predicated region fallthrough
CT: control target
= control target key end

     0   :  { %13 = vsyncpa [#allocation3], 0  ;;  %s602_s0 = inlined_call_operand.hbm [shape: f32[8,32], index: 0, kind: input, shape index: {}]   ;;  %s603_s1 = inlined_call_operand.hbm [shape: f32[8,64], index: 1, kind: input, shape index: {}]   ;;  %s604_s2 = inlined_call_operand.hbm [shape: f32[8,64], index: 2, kind: input, shape index: {}]   ;;  %s605_s3 = inlined_call_operand.hbm [shape: f32[32,64], index: 3, kind: input, shape index: {}]   ;;  %s606_s4 = inlined_call_operand.vmem [shape: f32[1,64], index: 4, kind: input, shape index: {}]   ;;  %s607_s5 = inlined_call_operand.hbm [shape: f32[64,64], index: 5, kind: input, shape index: {}]   ;;  %s608_s6 = inlined_call_operand.vmem [shape: f32[1,64], index: 6, kind: input, shape index: {}]   ;;  %s609_s7 = inlined_call_operand.vmem [shape: s32[1,64], index: 7, kind: input, shape index: {}]   ;;  %s610_s8 = inlined_call_operand.hbm [shape: f32[8,64], index: 8, kind: output, shape index: {}]  }
   0x1   :  { %14 = vsyncpa [#allocation6], 0 }
   0x2   :  { %15 = vsyncpa [#allocation9], 0 }
   0x3   :  { %16 = vsyncpa [#allocation4], 0  ;;  %s511_s27 = smov [#allocation5]   ;;  %s512_s29 = smov [#allocation8]  }
   0x4   :  { %s33_s28 = sshll.u32 %s511_s27, 4  ;;  %s52_s30 = sshll.u32 %s512_s29, 4  ;;  %s34_s28 = int_to_ptr.vmem [resolvable:$true] %s33_s28  ;;  %s53_s30 = int_to_ptr.vmem [resolvable:$true] %s52_s30 }
   0x5   :  { %s391_s9 = scalar_lea.vmem %s34_s28, 128  ;;  %p396_p1 = scmp.lt.s32.totalorder %s34_s28, %s34_s28 }
   0x6   :  { %p392_p0 = scmp.ne.s32.totalorder %s34_s28, %s391_s9  ;;  %p397_p2 = scmp.lt.s32.totalorder %s391_s9, %s391_s9 }
   0x8   :  { %p398_p3 = por %p397_p2, %p396_p1 }
   0xa   :  { %p399_p4 = pnand %p398_p3, %p392_p0 }
   0xc   :  { %402 = shalt.err (!%p399_p4)
}
   0xd   :  { %36 = dma.hbm_to_vmem [thread:$0]  %s603_s1, 128, %s34_s28, [#allocation6]  }
   0xe   :  { %s411_s12 = scalar_lea.vmem %s53_s30, 512  ;;  %p416_p6 = scmp.lt.s32.totalorder %s53_s30, %s53_s30 }
   0xf   :  { %p412_p5 = scmp.ne.s32.totalorder %s53_s30, %s411_s12  ;;  %p417_p7 = scmp.lt.s32.totalorder %s411_s12, %s411_s12 }
  0x11   :  { %p418_p8 = por %p417_p7, %p416_p6 }
  0x13   :  { %p419_p9 = pnand %p418_p8, %p412_p5 }
  0x15   :  { %422 = shalt.err (!%p419_p9)
}
  0x16   :  { %s513_s13 = smov 128   ;;  %s514_s14 = smov 8  }
  0x17   :  { %58 = dma.hbm_to_vmem [thread:$0]  %s605_s3, 512, %s53_s30, [#allocation9], %s513_s13, %s513_s13, %s514_s14  }
  0x18   :  { %s515_s17 = smov [#allocation2]   ;;  %s516_s19 = smov [#allocation7]  }
  0x19   :  { %s23_s18 = sshll.u32 %s515_s17, 4  ;;  %s43_s1 = sshll.u32 %s516_s19, 4  ;;  %s24_s18 = int_to_ptr.vmem [resolvable:$true] %s23_s18  ;;  %s44_s1 = int_to_ptr.vmem [resolvable:$true] %s43_s1 }
  0x1a   :  { %s431_s20 = scalar_lea.vmem %s24_s18, 128  ;;  %p436_p11 = scmp.lt.s32.totalorder %s24_s18, %s24_s18 }
  0x1b   :  { %p432_p10 = scmp.ne.s32.totalorder %s24_s18, %s431_s20  ;;  %p437_p12 = scmp.lt.s32.totalorder %s431_s20, %s431_s20 }
  0x1d   :  { %p438_p13 = por %p437_p12, %p436_p11 }
  0x1f   :  { %p439_p0 = pnand %p438_p13, %p432_p10 }
  0x21   :  { %442 = shalt.err (!%p439_p0)
}
  0x22   :  { %26 = dma.hbm_to_vmem [thread:$0]  %s602_s0, 128, %s24_s18, [#allocation3]  }
  0x23   :  { %s451_s23 = scalar_lea.vmem %s44_s1, 128  ;;  %p456_p2 = scmp.lt.s32.totalorder %s44_s1, %s44_s1 }
  0x24   :  { %p452_p1 = scmp.ne.s32.totalorder %s44_s1, %s451_s23  ;;  %p457_p3 = scmp.lt.s32.totalorder %s451_s23, %s451_s23 }
  0x26   :  { %p458_p4 = por %p457_p3, %p456_p2 }
  0x28   :  { %p459_p5 = pnand %p458_p4, %p452_p1 }
  0x2a   :  { %462 = shalt.err (!%p459_p5)
}
  0x2b   :  { %46 = dma.hbm_to_vmem [thread:$0]  %s604_s2, 128, %s44_s1, [#allocation6]  }
  0x2c   :  { %s517_s25 = smov [#allocation10]  }
  0x2d   :  { %s66_s26 = sshll.u32 %s517_s25, 4  ;;  %s67_s26 = int_to_ptr.vmem [resolvable:$true] %s66_s26 }
  0x2e   :  { %s471_s27 = scalar_lea.vmem %s67_s26, 1024  ;;  %p476_p7 = scmp.lt.s32.totalorder %s67_s26, %s67_s26 }
  0x2f   :  { %p472_p6 = scmp.ne.s32.totalorder %s67_s26, %s471_s27  ;;  %p477_p8 = scmp.lt.s32.totalorder %s471_s27, %s471_s27 }
  0x31   :  { %p478_p9 = por %p477_p8, %p476_p7 }
  0x33   :  { %p479_p10 = pnand %p478_p9, %p472_p6 }
  0x35   :  { %482 = shalt.err (!%p479_p10)
}
  0x36   :  { %72 = dma.hbm_to_vmem [thread:$0]  %s607_s5, 1024, %s67_s26, [#allocation9], %s513_s13, %s513_s13, %s514_s14  }
  0x37   :  { %503 = dma.done.wait [#allocation3], 128  }
  0x38   :  { %504 = vsyncadd [#allocation3], 4294967168 }
  0x39   :  { %505 = dma.done.wait [#allocation6], 256  }
  0x3a   :  { %506 = vsyncadd [#allocation6], 4294967040 }
  0x3b   :  { %507 = dma.done.wait [#allocation9], 1536  }
  0x3c   :  { %508 = vsyncadd [#allocation9], 4294965760  ;;  %v518_v0 = vmov 0.0   ;;  %vm519_vm0 = vmmov 0   ;;  %v99_v1 = vld [vmem:[#allocation8 + $0x18] sm:$0xff]  ;;  %v98_v2 = vld [vmem:[#allocation8 + $0x10] sm:$0xff]  ;;  %v294_v33 = vlaneseq }
  0x3d   :  { %336 = vmatprep.subr.mxu0 %v518_v0  ;;  %344 = vmatprep.mubr.msk.f32.mxu0 %vm519_vm0, %v518_v0  ;;  %v97_v3 = vld [vmem:[#allocation8 + $0x8] sm:$0xff]  ;;  %v96_v4 = vld [vmem:[#allocation8] sm:$0xff]  ;;  %vm107_vm1 = vcmask 261120   ;;  %v191_v6 = vld [vmem:[#allocation10 + $0x38] sm:$0xff]  ;;  %vm199_vm2 = vcmask 523264   ;;  %v520_v39 = vmov 0  }
  0x3e   :  { %347 = vmatprep.subr.mxu1 %v518_v0  ;;  %363 = vmatprep.mubr.msk.f32.mxu1 %vm519_vm0, %v518_v0  ;;  %v92_v5 = vld [vmem:[#allocation2] sm:$0xff]  ;;  %v190_v7 = vld [vmem:[#allocation10 + $0x30] sm:$0xff]  ;;  %v188_v9 = vld [vmem:[#allocation10 + $0x20] sm:$0xff]  ;;  %v295_v35 = vshrl.u32 %v294_v33, 7 }
  0x3f   :  { %337 = vmatpush3.msra.mxu0 %v99_v1  ;;  %348 = vmatpush3.msra.mxu1 %v191_v6  ;;  %v189_v8 = vld [vmem:[#allocation10 + $0x28] sm:$0xff]  ;;  %v187_v10 = vld [vmem:[#allocation10 + $0x18] sm:$0xff]  ;;  %v186_v11 = vld [vmem:[#allocation10 + $0x10] sm:$0xff] }
  0x40   :  { %338 = vmatprep.subr.mxu0 %v518_v0  ;;  %349 = vmatprep.subr.mxu1 %v518_v0  ;;  %v185_v12 = vld [vmem:[#allocation10 + $0x8] sm:$0xff]  ;;  %v184_v13 = vld [vmem:[#allocation10] sm:$0xff]  ;;  %v93_v18 = vld [vmem:[#allocation5] sm:$0xff]  ;;  %v296_v37 = vsub.s32 0, %v295_v35 }
  0x41   :  { %339 = vmatpush3.msra.mxu0 %v98_v2  ;;  %350 = vmatpush3.msra.mxu1 %v190_v7  ;;  %v318_v14 = vld [vmem:[%s606_s4] ss:$0 sm:$0xff]  ;;  %v94_v19 = vld [vmem:[#allocation7] sm:$0xff] }
  0x42   :  { %340 = vmatprep.subr.mxu0 %v518_v0  ;;  %351 = vmatprep.subr.mxu1 %v518_v0  ;;  %v95_v20 = vadd.f32 %v94_v19, %v93_v18  ;;  %v320_v24 = vld [vmem:[%s608_s6] ss:$0 sm:$0xff]  ;;  %s521_s6 = smov [#allocation11]  }
  0x43   :  { %341 = vmatpush3.msra.mxu0 %v97_v3  ;;  %352 = vmatpush3.msra.mxu1 %v189_v8  ;;  %v273_v34 = vld [vmem:[%s609_s7] sm:$0x1]  ;;  %s307_s10 = sshll.u32 %s521_s6, 4  ;;  %s308_s10 = int_to_ptr.vmem [resolvable:$true] %s307_s10 }
  0x44   :  { %342 = vmatprep.subr.mxu0 %v518_v0  ;;  %353 = vmatprep.subr.mxu1 %v518_v0  ;;  %vm274_vm3 = vcmp.ne.s32.totalorder %v273_v34, 0  ;;  %s483_s7 = scalar_lea.vmem %s308_s10, 128  ;;  %p488_p12 = scmp.lt.s32.totalorder %s308_s10, %s308_s10 }
  0x45   :  { %343 = vmatpush3.msra.mxu0 %v96_v4  ;;  %354 = vmatpush3.msra.mxu1 %v188_v9  ;;  %v293_v40 = vsel %vm274_vm3, 1, %v520_v39  ;;  %p484_p11 = scmp.ne.s32.totalorder %s308_s10, %s483_s7  ;;  %p489_p13 = scmp.lt.s32.totalorder %s483_s7, %s483_s7 }
  0x46   :  { %345 = vmatmul.mubr.msk.f32.vlgmr.msra.gmra.mxu0 %vm107_vm1, %v92_v5  ;;  %355 = vmatprep.subr.mxu1 %v518_v0  ;;  %v297_v43 = vrot.slane %v293_v40, %v296_v37 }
  0x47   :  { %356 = vmatpush3.msra.mxu1 %v187_v10  ;;  %p490_p0 = por %p489_p13, %p488_p12 }
  0x48   :  { %357 = vmatprep.subr.mxu1 %v518_v0  ;;  %vm298_vm5 = vcmp.eq.s32.totalorder %v297_v43, 1 }
  0x49   :  { %358 = vmatpush3.msra.mxu1 %v186_v11  ;;  %p491_p1 = pnand %p490_p0, %p484_p11 }
  0x4a   :  { %359 = vmatprep.subr.mxu1 %v518_v0 }
  0x4b   :  { %360 = vmatpush3.msra.mxu1 %v185_v12 }
  0x4c   :  { %361 = vmatprep.subr.mxu1 %v518_v0 }
  0x4d   :  { %362 = vmatpush3.msra.mxu1 %v184_v13 }
 0x106   :  { %v177_v15 = vpop.f32.mrf.mxu0 }
 0x107   :  { %v178_v16 = vadd.f32 %v318_v14, %v177_v15 }
 0x108   :  { %v346_v17 = vpop.f32.mrf.mxu0 }
 0x109   :  { %377 = vtanh.f32 %v178_v16 }
 0x116   :  { %v378_v21 = vpop.eup %377 }
 0x117   :  { %v182_v22 = vadd.f32 %v378_v21, %v95_v20 }
 0x119   :  { %v183_v23 = vmul.f32 0.33333334, %v182_v22 }
 0x11b   :  { %364 = vmatmul.mubr.msk.f32.vlgmr.msra.gmra.mxu1 %vm199_vm2, %v183_v23 }
 0x1db   :  { %v269_v25 = vpop.f32.mrf.mxu1 }
 0x1dc   :  { %v270_v26 = vadd.f32 %v320_v24, %v269_v25 }
 0x1dd   :  { %v365_v27 = vpop.f32.mrf.mxu1 }
 0x1de   :  { %v278_v28 = vand.u32 2147483647, %v270_v26  ;;  %v275_v46 = vmax.f32 %v270_v26, 0.0  ;;  %vm276_vm6 = vcmp.ne.f32.partialorder %v270_v26, %v270_v26 }
 0x1e0   :  { %v279_v29 = vsub.f32 0.0, %v278_v28 }
 0x1e2   :  { %v280_v30 = vmul.f32 1.442695, %v279_v29 }
 0x1e4   :  { %379 = vpow2.f32 %v280_v30 }
 0x1f1   :  { %v380_v31 = vpop.eup %379 }
 0x1f2   :  { %v282_v32 = vadd.f32 1.0, %v380_v31  ;;  %v285_v36 = vmul.f32 -0.5, %v380_v31  ;;  %v288_v41 = vand.u32 2147483647, %v380_v31 }
 0x1f4   :  { %381 = vlog2.f32 %v282_v32  ;;  %v286_v38 = vadd.f32 1.0, %v285_v36  ;;  %vm289_vm4 = vcmp.lt.f32.partialorder %v288_v41, 0.0004427343 }
 0x1f6   :  { %v287_v45 = vmul.f32 %v380_v31, %v286_v38 }
 0x201   :  { %v382_v42 = vpop.eup %381 }
 0x202   :  { %v284_v44 = vmul.f32 0.6931472, %v382_v42 }
 0x204   :  { %v290_v47 = vsel %vm289_vm4, %v287_v45, %v284_v44 }
 0x205   :  { %v291_v48 = vadd.f32 %v290_v47, %v275_v46 }
 0x207   :  { %v292_v49 = vsel %vm276_vm6, %v270_v26, %v291_v48 }
 0x208   :  { %v299_v50 = vsel %vm298_vm5, %v270_v26, %v292_v49 }
 0x209   :  { %300 = vst.msk [vmem:[#allocation11] sm:$0xff] %vm199_vm2, %v299_v50 }
 0x20a   :  { %494 = shalt.err (!%p491_p1)
}
 0x20b   :  { %310 = dma.vmem_to_hbm [thread:$0]  %s308_s10, 128, %s610_s8, [#allocation4]  }
 0x20c   :  { %509 = dma.done.wait [#allocation4], 128  }
 0x20d   :  { %510 = vsyncadd [#allocation4], 4294967168 }
 0x20e   :  { %314 = vsyncpa [#allocation3], 1 }
 0x20f   :  { %315 = vsyncpa [#allocation6], 1 }
 0x210   :  { %316 = vsyncpa [#allocation9], 1 }
 0x211   :  { %317 = vsyncpa [#allocation4], 1 }

</bundles_post_ra>
